<compile_context>
chip_gen: v6e
topology: v6e:2x2x1
jax: 0.10.0
libtpu: 0.0.40
codegen_flags: <defaults>
</compile_context>

<pallas_src>
import jax
import jax.numpy as jnp
from jax.experimental import pallas as pl
from jax.experimental.pallas import tpu as pltpu

IN_SIZE = 25      # logical input features (kept as-is; no input repack)
H1 = 128
H2 = 64
OUT = 3           # logical output features
OUT_PAD = 8       # output features zero-padded 3 -> 8 (sublane-aligned, small writeback)


def _mlp_kernel(x_ref, w1_ref, b1_ref, w2_ref, b2_ref, w3_ref, b3_ref, o_ref):
    # In-kernel cast of x to the weight compute dtype (VPU cast, free).
    x = x_ref[...].astype(w1_ref.dtype)                                   # (Bt, 25)
    h1 = jnp.dot(x, w1_ref[...], preferred_element_type=jnp.float32)      # (Bt, 128)
    h1 = jnp.maximum(h1 + b1_ref[...], 0.0)                               # ReLU, f32
    # Dropout(0.2): identity at inference time.
    # TODO(synk): training-mode dropout (pltpu.prng_random_bits mask) not emitted.
    h2 = jnp.dot(h1.astype(w2_ref.dtype), w2_ref[...],
                 preferred_element_type=jnp.float32)                      # (Bt, 64)
    h2 = jnp.maximum(h2 + b2_ref[...], 0.0)                               # ReLU, f32
    y = jnp.dot(h2.astype(w3_ref.dtype), w3_ref[...],
                preferred_element_type=jnp.float32)                       # (Bt, 8)
    o_ref[...] = jnp.tanh(y + b3_ref[...]).astype(o_ref.dtype)


def prepare_params(params, compute_dtype=jnp.bfloat16):
    """One-time weight/bias prep (cast + output-column padding).

    Hoisted out of the forward call so the small pad/cast XLA ops and their
    HBM round trips are not paid on every inference call.
    """
    w1, b1, w2, b2, w3, b3 = params
    w1_p = w1.astype(compute_dtype)                                  # (25, 128)
    w2_p = w2.astype(compute_dtype)                                  # (128, 64)
    w3_p = jnp.zeros((H2, OUT_PAD), compute_dtype).at[:, :OUT].set(
        w3.astype(compute_dtype))                                    # (64, 8)
    b1_p = b1.reshape(1, H1).astype(jnp.float32)
    b2_p = b2.reshape(1, H2).astype(jnp.float32)
    b3_p = jnp.zeros((1, OUT_PAD), jnp.float32).at[:, :OUT].set(
        b3.reshape(1, OUT).astype(jnp.float32))
    return (w1_p, b1_p, w2_p, b2_p, w3_p, b3_p)


def _round_up(n, m):
    return ((n + m - 1) // m) * m


def _choose_batch_tile(batch, max_tile=2048):
    """Sublane-aligned batch tile; even tile count >= 2 for large batches so
    both v7x TensorCores get an even split (harmless on v5e/v6e)."""
    b8 = _round_up(batch, 8)
    if b8 <= max_tile:
        if b8 >= 512:                       # big enough to split across 2 TCs
            return _round_up((b8 + 1) // 2, 8)
        return b8                           # tiny batch: single small tile
    n = pl.cdiv(b8, max_tile)
    if n % 2:
        n += 1                              # even tile count
    return _round_up(pl.cdiv(b8, n), 8)


def regression_model_forward(x, prepared_params, *, max_batch_tile=2048,
                             out_dtype=jnp.float32):
    """x: (B, 25).  Returns (B, 3) = tanh(MLP(x)) in `out_dtype`."""
    w1_p, b1_p, w2_p, b2_p, w3_p, b3_p = prepared_params
    B = x.shape[0]

    batch_tile = _choose_batch_tile(B, max_batch_tile)
    num_tiles = pl.cdiv(B, batch_tile)
    b_pad = num_tiles * batch_tile
    if b_pad != B:
        # Batch padding only (feature dim 25 is untouched); zero rows produce
        # tanh(b3) rows that are sliced off below.
        x = jnp.pad(x, ((0, b_pad - B), (0, 0)))

    # Weights/biases: full-array blocks with constant index_map -> resident
    # in VMEM across grid steps (no per-step re-DMA).
    def whole(shape):
        return pl.BlockSpec(shape, lambda i: (0,) * len(shape))

    out = pl.pallas_call(
        _mlp_kernel,
        out_shape=jax.ShapeDtypeStruct((b_pad, OUT_PAD), out_dtype),
        grid_spec=pltpu.PrefetchScalarGridSpec(
            num_scalar_prefetch=0,
            grid=(num_tiles,),
            in_specs=[
                pl.BlockSpec((batch_tile, IN_SIZE), lambda i: (i, 0)),  # x tile
                whole((IN_SIZE, H1)),    # w1
                whole((1, H1)),          # b1
                whole((H1, H2)),         # w2
                whole((1, H2)),          # b2
                whole((H2, OUT_PAD)),    # w3 (zero-padded cols)
                whole((1, OUT_PAD)),     # b3 (zero-padded)
            ],
            out_specs=pl.BlockSpec((batch_tile, OUT_PAD), lambda i: (i, 0)),
        ),
        compiler_params=pltpu.CompilerParams(
            dimension_semantics=("parallel",)),
    )(x, w1_p, b1_p, w2_p, b2_p, w3_p, b3_p)

    # Strip batch and output-column padding.
    return out[:B, :OUT]


def init_params(key):
    """Deterministic synthetic parameters (PyTorch-Linear-like uniform init)."""
    def linear(key, fan_in, fan_out):
        kw, kb = jax.random.split(key)
        bound = 1.0 / jnp.sqrt(fan_in)
        w = jax.random.uniform(kw, (fan_in, fan_out), jnp.float32, -bound, bound)
        b = jax.random.uniform(kb, (1, fan_out), jnp.float32, -bound, bound)
        return w, b

    k1, k2, k3 = jax.random.split(key, 3)
    w1, b1 = linear(k1, IN_SIZE, H1)
    w2, b2 = linear(k2, H1, H2)
    w3, b3 = linear(k3, H2, OUT)
    return (w1, b1, w2, b2, w3, b3)


def _reference(x, params):
    w1, b1, w2, b2, w3, b3 = params
    h1 = jnp.maximum(x @ w1 + b1, 0.0)
    h2 = jnp.maximum(h1 @ w2 + b2, 0.0)
    return jnp.tanh(h2 @ w3 + b3)


if __name__ == "__main__":
    key = jax.random.PRNGKey(0)
    kx, kp = jax.random.split(key)
    B = 8
    x = jax.random.normal(kx, (B, IN_SIZE), jnp.float32)
    params = init_params(kp)
    ref = _reference(x, params)

    # Fast path: bf16 weights / in-kernel bf16 cast of x, f32 accumulation.
    p_bf16 = prepare_params(params, jnp.bfloat16)
    out_bf16 = jax.block_until_ready(regression_model_forward(x, p_bf16))
    assert out_bf16.shape == (B, OUT)
    assert float(jnp.max(jnp.abs(out_bf16 - ref))) < 2e-2, "bf16 mismatch"

    # f32 compute path (same kernel, f32 weights).
    p_f32 = prepare_params(params, jnp.float32)
    out_f32 = jax.block_until_ready(regression_model_forward(x, p_f32))
    assert out_f32.shape == (B, OUT)
    assert float(jnp.max(jnp.abs(out_f32 - ref))) < 2e-2, "f32 mismatch"

    print("KERNEL_OK")
</pallas_src>

<mosaic_0001>
module attributes {stable_mosaic.version = 11 : i64} {
  func.func @_mlp_kernel(%arg0: i32, %arg1: memref<8x25xf32, #tpu.memory_space<vmem>>, %arg2: memref<25x128xbf16, #tpu.memory_space<vmem>>, %arg3: memref<1x128xf32, #tpu.memory_space<vmem>>, %arg4: memref<128x64xbf16, #tpu.memory_space<vmem>>, %arg5: memref<1x64xf32, #tpu.memory_space<vmem>>, %arg6: memref<64x8xbf16, #tpu.memory_space<vmem>>, %arg7: memref<1x8xf32, #tpu.memory_space<vmem>>, %arg8: memref<8x8xf32, #tpu.memory_space<vmem>>) attributes {dimension_semantics = [#tpu.dimension_semantics<parallel>], iteration_bounds = array<i64: 1>, scalar_prefetch = 0 : i64, scratch_operands = 0 : i64, tpu.core_type = #tpu.core_type<tc>, window_params = [{transform_indices = @transform_0, window_bounds = array<i64: 8, 25>}, {pipeline_mode = #tpu.pipeline_mode<synchronous>, transform_indices = @transform_1, window_bounds = array<i64: 25, 128>}, {pipeline_mode = #tpu.pipeline_mode<synchronous>, transform_indices = @transform_2, window_bounds = array<i64: 1, 128>}, {pipeline_mode = #tpu.pipeline_mode<synchronous>, transform_indices = @transform_3, window_bounds = array<i64: 128, 64>}, {pipeline_mode = #tpu.pipeline_mode<synchronous>, transform_indices = @transform_4, window_bounds = array<i64: 1, 64>}, {pipeline_mode = #tpu.pipeline_mode<synchronous>, transform_indices = @transform_5, window_bounds = array<i64: 64, 8>}, {pipeline_mode = #tpu.pipeline_mode<synchronous>, transform_indices = @transform_6, window_bounds = array<i64: 1, 8>}, {transform_indices = @transform_7, window_bounds = array<i64: 8, 8>}]} {
    %c0 = arith.constant 0 : index
    %c0_0 = arith.constant 0 : index
    %0 = vector.load %arg1[%c0, %c0_0] : memref<8x25xf32, #tpu.memory_space<vmem>>, vector<8x25xf32>
    %1 = arith.truncf %0 : vector<8x25xf32> to vector<8x25xbf16>
    %c0_1 = arith.constant 0 : index
    %c0_2 = arith.constant 0 : index
    %2 = vector.load %arg2[%c0_1, %c0_2] : memref<25x128xbf16, #tpu.memory_space<vmem>>, vector<25x128xbf16>
    %cst = arith.constant dense<0.000000e+00> : vector<8x128xf32>
    %3 = tpu.matmul %1, %2, %cst {dimension_numbers = #tpu.dot_dimension_numbers<[1], [0], [0], [1], [0, 0, 1, 1], [], []>} : vector<8x25xbf16>, vector<25x128xbf16>, vector<8x128xf32> -> vector<8x128xf32>
    %c0_3 = arith.constant 0 : index
    %c0_4 = arith.constant 0 : index
    %4 = vector.load %arg3[%c0_3, %c0_4] : memref<1x128xf32, #tpu.memory_space<vmem>>, vector<1x128xf32>
    %5 = vector.broadcast %4 : vector<1x128xf32> to vector<8x128xf32>
    %6 = arith.addf %3, %5 : vector<8x128xf32>
    %cst_5 = arith.constant 0.000000e+00 : f32
    %7 = vector.broadcast %cst_5 : f32 to vector<8x128xf32>
    %8 = arith.maximumf %6, %7 : vector<8x128xf32>
    %9 = arith.truncf %8 : vector<8x128xf32> to vector<8x128xbf16>
    %c0_6 = arith.constant 0 : index
    %c0_7 = arith.constant 0 : index
    %10 = vector.load %arg4[%c0_6, %c0_7] : memref<128x64xbf16, #tpu.memory_space<vmem>>, vector<128x64xbf16>
    %cst_8 = arith.constant dense<0.000000e+00> : vector<8x64xf32>
    %11 = tpu.matmul %9, %10, %cst_8 {dimension_numbers = #tpu.dot_dimension_numbers<[1], [0], [0], [1], [0, 0, 1, 1], [], []>} : vector<8x128xbf16>, vector<128x64xbf16>, vector<8x64xf32> -> vector<8x64xf32>
    %c0_9 = arith.constant 0 : index
    %c0_10 = arith.constant 0 : index
    %12 = vector.load %arg5[%c0_9, %c0_10] : memref<1x64xf32, #tpu.memory_space<vmem>>, vector<1x64xf32>
    %13 = vector.broadcast %12 : vector<1x64xf32> to vector<8x64xf32>
    %14 = arith.addf %11, %13 : vector<8x64xf32>
    %cst_11 = arith.constant 0.000000e+00 : f32
    %15 = vector.broadcast %cst_11 : f32 to vector<8x64xf32>
    %16 = arith.maximumf %14, %15 : vector<8x64xf32>
    %17 = arith.truncf %16 : vector<8x64xf32> to vector<8x64xbf16>
    %c0_12 = arith.constant 0 : index
    %c0_13 = arith.constant 0 : index
    %18 = vector.load %arg6[%c0_12, %c0_13] : memref<64x8xbf16, #tpu.memory_space<vmem>>, vector<64x8xbf16>
    %cst_14 = arith.constant dense<0.000000e+00> : vector<8x8xf32>
    %19 = tpu.matmul %17, %18, %cst_14 {dimension_numbers = #tpu.dot_dimension_numbers<[1], [0], [0], [1], [0, 0, 1, 1], [], []>} : vector<8x64xbf16>, vector<64x8xbf16>, vector<8x8xf32> -> vector<8x8xf32>
    %c0_15 = arith.constant 0 : index
    %c0_16 = arith.constant 0 : index
    %20 = vector.load %arg7[%c0_15, %c0_16] : memref<1x8xf32, #tpu.memory_space<vmem>>, vector<1x8xf32>
    %21 = vector.broadcast %20 : vector<1x8xf32> to vector<8x8xf32>
    %22 = arith.addf %19, %21 : vector<8x8xf32>
    %23 = math.tanh %22 : vector<8x8xf32>
    %c0_17 = arith.constant 0 : index
    %c0_18 = arith.constant 0 : index
    %24 = vector.load %arg8[%c0_17, %c0_18] : memref<8x8xf32, #tpu.memory_space<vmem>>, vector<8x8xf32>
    tpu.vector_store %arg8[%c0_17, %c0_18], %23 {strides = array<i32>} : memref<8x8xf32, #tpu.memory_space<vmem>>, vector<8x8xf32>,
    return
  }
  func.func @transform_0(%arg0: i32) -> (i32, i32) {
    %c0_i32 = arith.constant 0 : i32
    %c0_i32_0 = arith.constant 0 : i32
    return %arg0, %c0_i32 : i32, i32
  }
  func.func @transform_1(%arg0: i32) -> (i32, i32) {
    %c0_i32 = arith.constant 0 : i32
    %c0_i32_0 = arith.constant 0 : i32
    %c0_i32_1 = arith.constant 0 : i32
    return %c0_i32, %c0_i32_0 : i32, i32
  }
  func.func @transform_2(%arg0: i32) -> (i32, i32) {
    %c0_i32 = arith.constant 0 : i32
    %c0_i32_0 = arith.constant 0 : i32
    %c0_i32_1 = arith.constant 0 : i32
    return %c0_i32, %c0_i32_0 : i32, i32
  }
  func.func @transform_3(%arg0: i32) -> (i32, i32) {
    %c0_i32 = arith.constant 0 : i32
    %c0_i32_0 = arith.constant 0 : i32
    %c0_i32_1 = arith.constant 0 : i32
    return %c0_i32, %c0_i32_0 : i32, i32
  }
  func.func @transform_4(%arg0: i32) -> (i32, i32) {
    %c0_i32 = arith.constant 0 : i32
    %c0_i32_0 = arith.constant 0 : i32
    %c0_i32_1 = arith.constant 0 : i32
    return %c0_i32, %c0_i32_0 : i32, i32
  }
  func.func @transform_5(%arg0: i32) -> (i32, i32) {
    %c0_i32 = arith.constant 0 : i32
    %c0_i32_0 = arith.constant 0 : i32
    %c0_i32_1 = arith.constant 0 : i32
    return %c0_i32, %c0_i32_0 : i32, i32
  }
  func.func @transform_6(%arg0: i32) -> (i32, i32) {
    %c0_i32 = arith.constant 0 : i32
    %c0_i32_0 = arith.constant 0 : i32
    %c0_i32_1 = arith.constant 0 : i32
    return %c0_i32, %c0_i32_0 : i32, i32
  }
  func.func @transform_7(%arg0: i32) -> (i32, i32) {
    %c0_i32 = arith.constant 0 : i32
    %c0_i32_0 = arith.constant 0 : i32
    return %arg0, %c0_i32 : i32, i32
  }
}

</mosaic_0001>

<bundles_post_ra>
// kernel: tpu_custom_call.1
= control target key start
LH: loop header
LB: loop body
LE: loop exit
PB: predicated region body
PF: predicated region fallthrough
CT: control target
= control target key end

     0   :  { %vm56_vm0 = vcmask 1043456   ;;  %v436_v0 = vmov 0.0   ;;  %vm57_vm1 = vcmask 1044480   ;;  %v437_v2 = vmov 65535   ;;  %s540_s0 = inlined_call_operand.vmem [shape: f32[8,25], index: 0, kind: input, shape index: {}]   ;;  %s541_s1 = inlined_call_operand.vmem [shape: bf16[25,128], index: 1, kind: input, shape index: {}]   ;;  %s542_s2 = inlined_call_operand.vmem [shape: f32[1,128], index: 2, kind: input, shape index: {}]   ;;  %s543_s3 = inlined_call_operand.vmem [shape: bf16[128,64], index: 3, kind: input, shape index: {}]   ;;  %s544_s4 = inlined_call_operand.vmem [shape: f32[1,64], index: 4, kind: input, shape index: {}]   ;;  %s545_s5 = inlined_call_operand.vmem [shape: bf16[64,8], index: 5, kind: input, shape index: {}]   ;;  %s546_s6 = inlined_call_operand.vmem [shape: f32[1,8], index: 6, kind: input, shape index: {}]   ;;  %s547_s7 = inlined_call_operand.hbm [shape: f32[8,8], index: 7, kind: output, shape index: {}]  }
   0x1   :  { %354 = vmatprep.subr.bf16.mxu0 %v436_v0  ;;  %v398_v1 = vld [vmem:[%s541_s1 + $0x8] sm:$0x1f]   ;;  %362 = vmatprep.subr.bf16.mxu1 %v436_v0  ;;  %v58_v3 = vsel %vm56_vm0, 4294967295, %v437_v2  ;;  %vm438_vm2 = vmmov 0   ;;  %v399_v6 = vld [vmem:[%s541_s1] sm:$0xff]   ;;  %v400_v7 = vld [vmem:[%s543_s3 + $0x38] sm:$0xff]  }
   0x2   :  { %v59_v4 = vsel %vm57_vm1, %v58_v3, 0  ;;  %358 = vmatprep.mubr.msk.bf16.mxu0 %vm438_vm2, %v436_v0  ;;  %378 = vmatprep.mubr.msk.bf16.mxu1 %vm438_vm2, %v436_v0  ;;  %v28_v8 = vld [vmem:[%s540_s0] sm:$0xff]  ;;  %v401_v9 = vld [vmem:[%s543_s3 + $0x30] sm:$0xff]   ;;  %vm52_vm3 = vcmask 203776   ;;  %v402_v11 = vld [vmem:[%s543_s3 + $0x28] sm:$0xff]  }
   0x3   :  { %v61_v5 = vand.u32 %v398_v1, %v59_v4  ;;  %363 = vmatpush3.bf16.msra.mxu1 %v400_v7  ;;  %v29_v10 = vpack.c.bf16 %v28_v8, %v28_v8 }
   0x4   :  { %364 = vmatprep.subr.bf16.mxu1 %v436_v0 }
   0x5   :  { %355 = vmatpush3.bf16.msra.mxu0 %v61_v5 }
   0x6   :  { %356 = vmatprep.subr.bf16.mxu0 %v436_v0 }
   0x7   :  { %365 = vmatpush3.bf16.msra.mxu1 %v401_v9 }
   0x8   :  { %366 = vmatprep.subr.bf16.mxu1 %v436_v0 }
   0x9   :  { %357 = vmatpush3.bf16.msra.mxu0 %v399_v6 }
   0xa   :  { %382 = vmatprep.subr.bf16.mxu0 %v436_v0 }
   0xc   :  { %359 = vmatmul.mubr.msk.bf16.vlgmr.msra.gmra.mxu0 %vm52_vm3, %v29_v10 }
   0xd   :  { %12 = vsyncpa [#allocation3], 0  ;;  %367 = vmatpush3.bf16.msra.mxu1 %v402_v11  ;;  %v403_v12 = vld [vmem:[%s543_s3 + $0x20] sm:$0xff]   ;;  %390 = vmatprep.mubr.msk.bf16.mxu0 %vm438_vm2, %v436_v0  ;;  %v404_v13 = vld [vmem:[%s543_s3 + $0x18] sm:$0xff]   ;;  %vm257_vm4 = vcmask 523264   ;;  %vm302_vm5 = vcmask 64512  }
   0xe   :  { %368 = vmatprep.subr.bf16.mxu1 %v436_v0  ;;  %v405_v14 = vld [vmem:[%s543_s3 + $0x10] sm:$0xff]   ;;  %v406_v15 = vld [vmem:[%s543_s3 + $0x8] sm:$0xff]   ;;  %v407_v16 = vld [vmem:[%s543_s3] sm:$0xff]  }
   0xf   :  { %v408_v17 = vld [vmem:[%s545_s5 + $0x18] sm:$0xff]   ;;  %v409_v18 = vld [vmem:[%s545_s5 + $0x10] sm:$0xff]   ;;  %v318_v19 = vld [vmem:[%s542_s2] ss:$0 sm:$0xff] }
  0x10   :  { %383 = vmatpush3.bf16.msra.mxu0 %v408_v17  ;;  %v410_v27 = vld [vmem:[%s545_s5 + $0x8] sm:$0xff]   ;;  %v411_v28 = vld [vmem:[%s545_s5] sm:$0xff]  }
  0x11   :  { %369 = vmatpush3.bf16.msra.mxu1 %v403_v12  ;;  %384 = vmatprep.subr.bf16.mxu0 %v436_v0  ;;  %v322_v29 = vld [vmem:[%s544_s4] ss:$0 sm:$0xff]  ;;  %s439_s4 = smov [#allocation2]  }
  0x12   :  { %370 = vmatprep.subr.bf16.mxu1 %v436_v0  ;;  %v331_v37 = vld [vmem:[%s546_s6] ss:$0 sm:$0xff]  ;;  %s310_s5 = sshll.u32 %s439_s4, 4  ;;  %s311_s5 = int_to_ptr.vmem [resolvable:$true] %s310_s5 }
  0x13   :  { %s414_s10 = scalar_lea.vmem %s311_s5, 128  ;;  %p419_p1 = scmp.lt.s32.totalorder %s311_s5, %s311_s5 }
  0x14   :  { %385 = vmatpush3.bf16.msra.mxu0 %v409_v18  ;;  %p415_p0 = scmp.ne.s32.totalorder %s311_s5, %s414_s10  ;;  %p420_p2 = scmp.lt.s32.totalorder %s414_s10, %s414_s10 }
  0x15   :  { %371 = vmatpush3.bf16.msra.mxu1 %v404_v13  ;;  %386 = vmatprep.subr.bf16.mxu0 %v436_v0 }
  0x16   :  { %372 = vmatprep.subr.bf16.mxu1 %v436_v0  ;;  %p421_p3 = por %p420_p2, %p419_p1 }
  0x18   :  { %387 = vmatpush3.bf16.msra.mxu0 %v410_v27  ;;  %p422_p4 = pnand %p421_p3, %p415_p0 }
  0x19   :  { %373 = vmatpush3.bf16.msra.mxu1 %v405_v14  ;;  %388 = vmatprep.subr.bf16.mxu0 %v436_v0 }
  0x1a   :  { %374 = vmatprep.subr.bf16.mxu1 %v436_v0 }
  0x1c   :  { %389 = vmatpush3.bf16.msra.mxu0 %v411_v28 }
  0x1d   :  { %375 = vmatpush3.bf16.msra.mxu1 %v406_v15 }
  0x1e   :  { %376 = vmatprep.subr.bf16.mxu1 %v436_v0 }
  0x21   :  { %377 = vmatpush3.bf16.msra.mxu1 %v407_v16 }
  0xcc   :  { %v97_v20 = vpop.f32.mrf.mxu0 }
  0xcd   :  { %v98_v21 = vadd.f32 %v318_v19, %v97_v20 }
  0xce   :  { %v360_v22 = vpop.f32.mrf.mxu0 }
  0xcf   :  { %v103_v23 = vmax.f32 %v98_v21, 0.0 }
  0xd0   :  { %v100_v24 = vpop.f32.mrf.mxu0 }
  0xd1   :  { %v104_v25 = vpack.c.bf16 %v103_v23, %v103_v23 }
  0xd2   :  { %v361_v26 = vpop.f32.mrf.mxu0 }
  0xd3   :  { %379 = vmatmul.mubr.bf16.vlgmr.msra.gmra.mxu1 %v104_v25 }
 0x193   :  { %v210_v30 = vpop.f32.mrf.mxu1 }
 0x194   :  { %v211_v31 = vadd.f32 %v322_v29, %v210_v30 }
 0x195   :  { %v380_v32 = vpop.f32.mrf.mxu1 }
 0x196   :  { %v216_v33 = vmax.f32 %v211_v31, 0.0 }
 0x197   :  { %v213_v34 = vpop.f32.mrf.mxu1 }
 0x198   :  { %v217_v35 = vpack.c.bf16 %v216_v33, %v216_v33 }
 0x199   :  { %v381_v36 = vpop.f32.mrf.mxu1 }
 0x19a   :  { %391 = vmatmul.mubr.msk.bf16.vlgmr.msra.gmra.mxu0 %vm257_vm4, %v217_v35 }
 0x25a   :  { %v295_v38 = vpop.f32.mrf.mxu0 }
 0x25b   :  { %v296_v39 = vadd.f32 %v331_v37, %v295_v38 }
 0x25c   :  { %v392_v40 = vpop.f32.mrf.mxu0 }
 0x25d   :  { %412 = vtanh.f32 %v296_v39 }
 0x25e   :  { %v298_v41 = vpop.f32.mrf.mxu0 }
 0x260   :  { %v393_v42 = vpop.f32.mrf.mxu0 }
 0x26a   :  { %v413_v43 = vpop.eup %412 }
 0x26b   :  { %303 = vst.msk [vmem:[#allocation2] sm:$0xff] %vm302_vm5, %v413_v43 }
 0x26c   :  { %425 = shalt.err (!%p422_p4)
}
 0x26d   :  { %313 = dma.vmem_to_hbm [thread:$0]  %s311_s5, 128, %s547_s7, [#allocation3]  }
 0x26e   :  { %434 = dma.done.wait [#allocation3], 128  }
 0x26f   :  { %435 = vsyncadd [#allocation3], 4294967168 }
 0x270   :  { %317 = vsyncpa [#allocation3], 1 }

</bundles_post_ra>
